<compile_context>
chip_gen: v7x
topology: tpu7x:2x2x1
jax: 0.10.0
libtpu: 0.0.40
codegen_flags: <defaults>
</compile_context>

<pallas_src>
import jax
import jax.numpy as jnp
from jax.experimental import pallas as pl
from jax.experimental.pallas import tpu as pltpu


# --------------------------------------------------------------------------- #
# Stage 1: meta_net  (Linear -> ReLU -> Linear), batched over all B rows once.
# --------------------------------------------------------------------------- #
def meta_net_kernel(im_ref, w1_ref, b1_ref, w2_ref, b2_ref, bias_ref):
    h = jnp.dot(im_ref[...], w1_ref[...], preferred_element_type=jnp.float32)
    h = jnp.maximum(h + b1_ref[...], 0.0)                                  # ReLU
    out = jnp.dot(h, w2_ref[...], preferred_element_type=jnp.float32) + b2_ref[...]
    bias_ref[...] = out.astype(bias_ref.dtype)                             # (B, ctx_dim)


# --------------------------------------------------------------------------- #
# Stage 2: prompt assembly.  One grid step = (one batch element, one n_cls tile).
# Direct slice stores into out_ref -- no concatenated temporary.
# --------------------------------------------------------------------------- #
def assemble_kernel(bias_ref, ctx_ref, prefix_ref, suffix_ref, out_ref):
    pre_len = prefix_ref.shape[1]
    n_ctx, ctx_dim = ctx_ref.shape
    tc = out_ref.shape[0]                       # class-tile size (static)

    # prefix segment: rows [0, pre_len)
    out_ref[:, :pre_len, :] = prefix_ref[...].astype(out_ref.dtype)

    # ctx segment: rows [pre_len, pre_len + n_ctx) -- ctx + per-image bias,
    # broadcast across the class tile.
    ctx_shifted = (ctx_ref[...] + bias_ref[0]).astype(out_ref.dtype)       # (n_ctx, ctx_dim)
    out_ref[:, pre_len:pre_len + n_ctx, :] = jnp.broadcast_to(
        ctx_shifted[None, :, :], (tc, n_ctx, ctx_dim))

    # suffix segment: rows [pre_len + n_ctx, seq_len)
    out_ref[:, pre_len + n_ctx:, :] = suffix_ref[...].astype(out_ref.dtype)


def _pick_class_tile(n_cls, cap=32):
    """Largest divisor of n_cls that is <= cap (keeps per-step blocks small)."""
    for t in range(min(cap, n_cls), 0, -1):
        if n_cls % t == 0:
            return t
    return 1


def prompt_learner_forward(im_features, w1, b1, w2, b2, ctx,
                           token_prefix, token_suffix,
                           *, out_dtype=jnp.bfloat16, class_tile=None):
    B, vis_dim = im_features.shape
    hidden = w1.shape[1]
    n_ctx, ctx_dim = ctx.shape
    n_cls, pre_len, _ = token_prefix.shape
    suf_len = token_suffix.shape[1]
    seq_len = pre_len + n_ctx + suf_len

    # ---- Stage 1: batched meta_net (tiny; whole arrays fit VMEM, single step) ----
    b1_2d = b1.reshape(1, hidden)
    b2_2d = b2.reshape(1, ctx_dim)
    bias = pl.pallas_call(
        meta_net_kernel,
        out_shape=jax.ShapeDtypeStruct((B, ctx_dim), jnp.float32),
    )(im_features, w1, b1_2d, w2, b2_2d)
    bias3 = bias.reshape(B, 1, ctx_dim)          # (B, 1, ctx_dim) for clean blocking

    # ---- Stage 2: tiled broadcast-writer ----
    tc = class_tile if class_tile is not None else _pick_class_tile(n_cls)
    assert n_cls % tc == 0, "class_tile must divide n_cls"
    num_c = n_cls // tc

    # prefix/suffix are pure copies into the output -> feed them in the output dtype
    # so the big HBM reads are half-width too.
    pre_c = token_prefix.astype(out_dtype)
    suf_c = token_suffix.astype(out_dtype)

    return pl.pallas_call(
        assemble_kernel,
        out_shape=jax.ShapeDtypeStruct((B, n_cls, seq_len, ctx_dim), out_dtype),
        grid=(B, num_c),
        in_specs=[
            pl.BlockSpec((1, 1, ctx_dim), lambda b, c: (b, 0, 0)),        # bias (per image)
            pl.BlockSpec((n_ctx, ctx_dim), lambda b, c: (0, 0)),           # ctx (shared)
            pl.BlockSpec((tc, pre_len, ctx_dim), lambda b, c: (c, 0, 0)),  # prefix tile
            pl.BlockSpec((tc, suf_len, ctx_dim), lambda b, c: (c, 0, 0)),  # suffix tile
        ],
        out_specs=pl.BlockSpec((None, tc, seq_len, ctx_dim),
                               lambda b, c: (b, c, 0, 0)),                 # leading dim squeezed
        compiler_params=pltpu.CompilerParams(
            dimension_semantics=("parallel", "parallel")),
    )(bias3, ctx, pre_c, suf_c)


def reference_forward(im_features, w1, b1, w2, b2, ctx, token_prefix, token_suffix):
    """Pure-JAX fp32 reference mirroring the PyTorch forward."""
    h = jnp.maximum(im_features @ w1 + b1, 0.0)
    bias = h @ w2 + b2                                     # (B, ctx_dim)
    ctx_shifted = ctx[None, :, :] + bias[:, None, :]       # (B, n_ctx, ctx_dim)
    n_cls = token_prefix.shape[0]
    B = im_features.shape[0]
    ctx_exp = jnp.broadcast_to(ctx_shifted[:, None, :, :],
                               (B, n_cls) + ctx_shifted.shape[1:])
    pre = jnp.broadcast_to(token_prefix[None], (B,) + token_prefix.shape)
    suf = jnp.broadcast_to(token_suffix[None], (B,) + token_suffix.shape)
    return jnp.concatenate([pre, ctx_exp, suf], axis=2)


if __name__ == "__main__":
    # Small, self-consistent shapes (real CLIP: vis_dim=512, ctx_dim=512, seq=77, n_cls~100).
    B = 2            # batch of image features
    vis_dim = 128    # clip_model.visual.output_dim
    hidden = vis_dim // 16
    ctx_dim = 128    # clip_model.ln_final.weight.shape[0]
    n_ctx = 4        # 'a photo of a' -> 4 context tokens
    n_cls = 4        # number of classnames
    suf_len = 3      # suffix length; seq_len = 1 + 4 + 3 = 8

    key = jax.random.PRNGKey(0)
    k = jax.random.split(key, 8)
    im_features = jax.random.normal(k[0], (B, vis_dim), jnp.float32)
    w1 = jax.random.normal(k[1], (vis_dim, hidden), jnp.float32) * 0.05
    b1 = jax.random.normal(k[2], (hidden,), jnp.float32) * 0.01
    w2 = jax.random.normal(k[3], (hidden, ctx_dim), jnp.float32) * 0.05
    b2 = jax.random.normal(k[4], (ctx_dim,), jnp.float32) * 0.01
    ctx = jax.random.normal(k[5], (n_ctx, ctx_dim), jnp.float32) * 0.02
    token_prefix = jax.random.normal(k[6], (n_cls, 1, ctx_dim), jnp.float32) * 0.02
    token_suffix = jax.random.normal(k[7], (n_cls, suf_len, ctx_dim), jnp.float32) * 0.02

    # class_tile=2 -> grid (B, 2): exercises the n_cls-tiling path.
    out = prompt_learner_forward(im_features, w1, b1, w2, b2, ctx,
                                 token_prefix, token_suffix, class_tile=2)
    out = jax.block_until_ready(out)

    ref = reference_forward(im_features, w1, b1, w2, b2, ctx,
                            token_prefix, token_suffix)
    assert out.shape == (B, n_cls, 1 + n_ctx + suf_len, ctx_dim), out.shape
    assert out.dtype == jnp.bfloat16, out.dtype
    assert jnp.allclose(out.astype(jnp.float32), ref, atol=1e-2, rtol=1e-2), \
        "mismatch vs reference"

    print("KERNEL_OK")
</pallas_src>

<mosaic_0001>
module attributes {stable_mosaic.version = 11 : i64} {
  func.func @meta_net_kernel(%arg0: memref<2x128xf32, #tpu.memory_space<vmem>>, %arg1: memref<128x8xf32, #tpu.memory_space<vmem>>, %arg2: memref<1x8xf32, #tpu.memory_space<vmem>>, %arg3: memref<8x128xf32, #tpu.memory_space<vmem>>, %arg4: memref<1x128xf32, #tpu.memory_space<vmem>>, %arg5: memref<2x128xf32, #tpu.memory_space<vmem>>) attributes {dimension_semantics = [], scalar_prefetch = 0 : i64, scratch_operands = 0 : i64, tpu.core_type = #tpu.core_type<tc>} {
    %c0 = arith.constant 0 : index
    %c0_0 = arith.constant 0 : index
    %0 = vector.load %arg0[%c0, %c0_0] : memref<2x128xf32, #tpu.memory_space<vmem>>, vector<2x128xf32>
    %c0_1 = arith.constant 0 : index
    %c0_2 = arith.constant 0 : index
    %1 = vector.load %arg1[%c0_1, %c0_2] : memref<128x8xf32, #tpu.memory_space<vmem>>, vector<128x8xf32>
    %cst = arith.constant dense<0.000000e+00> : vector<2x8xf32>
    %2 = tpu.matmul %0, %1, %cst {dimension_numbers = #tpu.dot_dimension_numbers<[1], [0], [0], [1], [0, 0, 1, 1], [], []>} : vector<2x128xf32>, vector<128x8xf32>, vector<2x8xf32> -> vector<2x8xf32>
    %c0_3 = arith.constant 0 : index
    %c0_4 = arith.constant 0 : index
    %3 = vector.load %arg2[%c0_3, %c0_4] : memref<1x8xf32, #tpu.memory_space<vmem>>, vector<1x8xf32>
    %4 = vector.broadcast %3 : vector<1x8xf32> to vector<2x8xf32>
    %5 = arith.addf %2, %4 : vector<2x8xf32>
    %cst_5 = arith.constant 0.000000e+00 : f32
    %6 = vector.broadcast %cst_5 : f32 to vector<2x8xf32>
    %7 = arith.maximumf %5, %6 : vector<2x8xf32>
    %c0_6 = arith.constant 0 : index
    %c0_7 = arith.constant 0 : index
    %8 = vector.load %arg3[%c0_6, %c0_7] : memref<8x128xf32, #tpu.memory_space<vmem>>, vector<8x128xf32>
    %cst_8 = arith.constant dense<0.000000e+00> : vector<2x128xf32>
    %9 = tpu.matmul %7, %8, %cst_8 {dimension_numbers = #tpu.dot_dimension_numbers<[1], [0], [0], [1], [0, 0, 1, 1], [], []>} : vector<2x8xf32>, vector<8x128xf32>, vector<2x128xf32> -> vector<2x128xf32>
    %c0_9 = arith.constant 0 : index
    %c0_10 = arith.constant 0 : index
    %10 = vector.load %arg4[%c0_9, %c0_10] : memref<1x128xf32, #tpu.memory_space<vmem>>, vector<1x128xf32>
    %11 = vector.broadcast %10 : vector<1x128xf32> to vector<2x128xf32>
    %12 = arith.addf %9, %11 : vector<2x128xf32>
    %c0_11 = arith.constant 0 : index
    %c0_12 = arith.constant 0 : index
    %13 = vector.load %arg5[%c0_11, %c0_12] : memref<2x128xf32, #tpu.memory_space<vmem>>, vector<2x128xf32>
    tpu.vector_store %arg5[%c0_11, %c0_12], %12 {strides = array<i32>} : memref<2x128xf32, #tpu.memory_space<vmem>>, vector<2x128xf32>,
    return
  }
}

</mosaic_0001>

<bundles_post_ra>
// kernel: tpu_custom_call.1
= control target key start
LH: loop header
LB: loop body
LE: loop exit
PB: predicated region body
PF: predicated region fallthrough
CT: control target
= control target key end

     0   :  { %v327_v3 = vmov 0.0|0.0   ;;  %vm328_vm0 = vmmov 0   ;;  %v329_v6 = vmov 0.0   ;;  %s433_s0 = inlined_call_operand.vmem [shape: f32[2,128], index: 0, kind: input, shape index: {}]   ;;  %s434_s1 = inlined_call_operand.vmem [shape: f32[128,8], index: 1, kind: input, shape index: {}]   ;;  %s435_s2 = inlined_call_operand.vmem [shape: f32[1,8], index: 2, kind: input, shape index: {}]   ;;  %s436_s3 = inlined_call_operand.vmem [shape: f32[8,128], index: 3, kind: input, shape index: {}]   ;;  %s437_s4 = inlined_call_operand.vmem [shape: f32[1,128], index: 4, kind: input, shape index: {}]   ;;  %s438_s5 = inlined_call_operand.hbm [shape: f32[2,128], index: 5, kind: output, shape index: {}]  }
   0x1   :  { %v22_v0 = vld [vmem:[%s434_s1] sm:$0xff]  ;;  %v23_v1 = vld [vmem:[%s434_s1 + $0x8] sm:$0xff]  ;;  %v24_v2 = vld [vmem:[%s434_s1 + $0x10] sm:$0xff]  ;;  %275 = vmatprep.subr.bf16.mxu0 %v327_v3  ;;  %267 = vmatprep.mubr.msk.f32.mxu0 %vm328_vm0, %v329_v6 }
   0x2   :  { %v276_v4 = vpack.c.bf16 %v23_v1, %v22_v0  ;;  %v25_v5 = vld [vmem:[%s434_s1 + $0x18] sm:$0xff]  ;;  %270 = vmatprep.subr.mxu1 %v329_v6  ;;  %272 = vmatprep.mubr.msk.f32.mxu1 %vm328_vm0, %v329_v6  ;;  %v26_v8 = vld [vmem:[%s434_s1 + $0x20] sm:$0xff]  ;;  %v27_v9 = vld [vmem:[%s434_s1 + $0x28] sm:$0xff] }
   0x3   :  { %v279_v7 = vpack.c.bf16 %v25_v5, %v24_v2 }
   0x4   :  { %277 = vmatpush3.bf16.msra.mxu0 %v276_v4 }
   0x5   :  { %278 = vmatprep.subr.bf16.mxu0 %v327_v3 }
   0x6   :  { %10 = vsyncpa [#allocation3], 0  ;;  %v282_v10 = vpack.c.bf16 %v27_v9, %v26_v8  ;;  %v28_v11 = vld [vmem:[%s434_s1 + $0x30] sm:$0xff]  ;;  %v29_v12 = vld [vmem:[%s434_s1 + $0x38] sm:$0xff]  ;;  %vm124_vm1 = vcmask 64512  }
   0x7   :  { %v285_v13 = vpack.c.bf16 %v29_v12, %v28_v11  ;;  %v30_v14 = vld [vmem:[%s434_s1 + $0x40] sm:$0xff]  ;;  %v31_v15 = vld [vmem:[%s434_s1 + $0x48] sm:$0xff]  ;;  %v32_v17 = vld [vmem:[%s434_s1 + $0x50] sm:$0xff] }
   0x8   :  { %280 = vmatpush3.bf16.msra.mxu0 %v279_v7  ;;  %v288_v16 = vpack.c.bf16 %v31_v15, %v30_v14  ;;  %v33_v18 = vld [vmem:[%s434_s1 + $0x58] sm:$0xff]  ;;  %v34_v20 = vld [vmem:[%s434_s1 + $0x60] sm:$0xff]  ;;  %v35_v21 = vld [vmem:[%s434_s1 + $0x68] sm:$0xff] }
   0x9   :  { %281 = vmatprep.subr.bf16.mxu0 %v327_v3  ;;  %v291_v19 = vpack.c.bf16 %v33_v18, %v32_v17  ;;  %v294_v22 = vpack.c.bf16 %v35_v21, %v34_v20  ;;  %v36_v23 = vld [vmem:[%s434_s1 + $0x70] sm:$0xff]  ;;  %v37_v24 = vld [vmem:[%s434_s1 + $0x78] sm:$0xff]  ;;  %v21_v26 = vld [vmem:[%s433_s0] sm:$0x3]  ;;  %s330_s0 = smov [#allocation2]  }
   0xa   :  { %v297_v25 = vpack.c.bf16 %v37_v24, %v36_v23  ;;  %v116_v27 = vld [vmem:[%s436_s3] sm:$0xff]  ;;  %s205_s7 = sshll.u32 %s330_s0, 4  ;;  %s206_s7 = int_to_ptr.vmem [resolvable:$true] %s205_s7 }
   0xb   :  { %271 = vmatpush3.msra.mxu1 %v116_v27  ;;  %v213_v28 = vld [vmem:[%s435_s2] ss:$0 sm:$0xff]  ;;  %s303_s3 = scalar_lea.vmem %s206_s7, 32  ;;  %p308_p1 = scmp.lt.s32.totalorder %s206_s7, %s206_s7 }
   0xc   :  { %283 = vmatpush3.bf16.msra.mxu0 %v282_v10  ;;  %v214_v33 = vld [vmem:[%s437_s4] ss:$0 sm:$0xff]  ;;  %p304_p0 = scmp.ne.s32.totalorder %s206_s7, %s303_s3  ;;  %p309_p2 = scmp.lt.s32.totalorder %s303_s3, %s303_s3 }
   0xd   :  { %284 = vmatprep.subr.bf16.mxu0 %v327_v3 }
   0xe   :  { %p310_p3 = por %p309_p2, %p308_p1 }
  0x10   :  { %286 = vmatpush3.bf16.msra.mxu0 %v285_v13  ;;  %p311_p4 = pnand %p310_p3, %p304_p0 }
  0x11   :  { %287 = vmatprep.subr.bf16.mxu0 %v327_v3 }
  0x14   :  { %289 = vmatpush3.bf16.msra.mxu0 %v288_v16 }
  0x15   :  { %290 = vmatprep.subr.bf16.mxu0 %v327_v3 }
  0x18   :  { %292 = vmatpush3.bf16.msra.mxu0 %v291_v19 }
  0x19   :  { %293 = vmatprep.subr.bf16.mxu0 %v327_v3 }
  0x1c   :  { %295 = vmatpush3.bf16.msra.mxu0 %v294_v22 }
  0x1d   :  { %296 = vmatprep.subr.bf16.mxu0 %v327_v3 }
  0x20   :  { %298 = vmatpush3.bf16.msra.mxu0 %v297_v25 }
  0x23   :  { %268 = vmatmul.mubr.f32.vlgmr.msra.gmra.mrb[0].mxu0 %v21_v26 }
  0xf6   :  { %v111_v29 = vpop.f32.mrb[0].mxu0 }
  0xf7   :  { %v112_v30 = vadd.f32 %v213_v28, %v111_v29  ;;  %v269_v31 = vpop.f32.mrb[1].mxu0 }
  0xf9   :  { %v115_v32 = vmax.f32 %v112_v30, 0.0 }
  0xfb   :  { %273 = vmatmul.mubr.msk.f32.vlgmr.msra.gmra.mrb[0].mxu1 %vm124_vm1, %v115_v32 }
 0x1ce   :  { %v194_v34 = vpop.f32.mrb[0].mxu1 }
 0x1cf   :  { %v195_v35 = vadd.f32 %v214_v33, %v194_v34  ;;  %v274_v36 = vpop.f32.mrb[1].mxu1 }
 0x1d1   :  { %198 = vst [vmem:[#allocation2] sm:$0x3] %v195_v35 }
 0x1d2   :  { %314 = shalt.err (!%p311_p4)
}
 0x1d3   :  { %s315_s9 = scalar_lea.hbm %s438_s5, 32 }
 0x1d4   :  { %p316_p5 = scmp.ne.s32.totalorder %s438_s5, %s315_s9  ;;  %p319_p6 = scmp.lt.u32.totalorder %s315_s9, %s438_s5 }
 0x1d6   :  { %p321_p7 = pnand %p319_p6, %p316_p5 }
 0x1d8   :  { %324 = shalt.err (!%p321_p7)
}
 0x1d9   :  { %208 = dma.vmem_to_hbm [thread:$0]  %s206_s7, 32, %s438_s5, [#allocation3]  }
 0x1da   :  { %325 = dma.done.wait [#allocation3], 32  }
 0x1db   :  { %326 = vsyncadd [#allocation3], 4294967264 }
 0x1dc   :  { %212 = vsyncpa [#allocation3], 1 }

</bundles_post_ra>
